<compile_context>
chip_gen: v7x
topology: tpu7x:2x2x1
jax: 0.10.0
libtpu: 0.0.40
codegen_flags: <defaults>
</compile_context>

<pallas_src>
import jax
import jax.numpy as jnp
from jax.experimental import pallas as pl
from jax.experimental.pallas import tpu as pltpu

EPS = 1e-5
_VMEM_BUDGET = 24 * 1024 * 1024   # tile-selection budget (leaves headroom)
_VMEM_LIMIT = 32 * 1024 * 1024    # declared scoped-VMEM limit (>= all defaults)


def _make_kernel(p_true: int):
    """Builds the fused kernel closed over the true pixel-row count."""
    inv_p = 1.0 / float(p_true)

    def kernel(a_ref, r_ref, m_ref, w1_ref, g1_ref, b1_ref,
               w2_ref, g2_ref, b2_ref, o_ref, acc_ref):
        # a_ref  : (Pp, C1) bf16  -- resident (same block every step)
        # r_ref  : (Pp, tc) bf16  -- residual tile
        # m_ref  : (Pp, 1)  f32   -- row mask (1 for real pixels, 0 for pad)
        # w1_ref : (C1, tc) bf16 ; w2_ref : (tc, C3) bf16
        # g*/b*  : (1, tc)/(1, C3) f32
        # o_ref  : (Pp, C3) f32 ; acc_ref: (Pp, C3) f32 persistent scratch
        j = pl.program_id(0)
        nsteps = pl.num_programs(0)

        @pl.when(j == 0)
        def _init():
            acc_ref[...] = jnp.zeros_like(acc_ref)

        mask = m_ref[...]                                   # (Pp, 1) f32

        # --- conv2d46 tile: (Pp, C1) @ (C1, tc) on the MXU, f32 accumulate ---
        y1 = jnp.dot(a_ref[...], w1_ref[...],
                     preferred_element_type=jnp.float32)     # (Pp, tc) f32

        # --- batchnorm2d46 (training-mode biased batch stats, per channel) ---
        # Padded rows of y1 are exactly zero (a's padded rows are zero), so
        # the mean needs no mask; the variance does (d1 = -mean1 on pad rows).
        mean1 = jnp.sum(y1, axis=0, keepdims=True) * inv_p
        d1 = y1 - mean1
        var1 = jnp.sum(d1 * d1 * mask, axis=0, keepdims=True) * inv_p
        y1n = d1 * jax.lax.rsqrt(var1 + EPS) * g1_ref[...] + b1_ref[...]

        # --- residual add (bf16 residual upcast to f32) + ReLU ---
        z = jnp.maximum(r_ref[...].astype(jnp.float32) + y1n, 0.0)

        # --- conv2d47 partial product: accumulate over C2 tiles ---
        acc_ref[...] += jnp.dot(z.astype(jnp.bfloat16), w2_ref[...],
                                preferred_element_type=jnp.float32)

        # --- epilogue on the last C2 tile: batchnorm2d47 + store ---
        @pl.when(j == nsteps - 1)
        def _finalize():
            y2 = acc_ref[...]
            mean2 = jnp.sum(y2 * mask, axis=0, keepdims=True) * inv_p
            d2 = y2 - mean2
            var2 = jnp.sum(d2 * d2 * mask, axis=0, keepdims=True) * inv_p
            o_ref[...] = (d2 * jax.lax.rsqrt(var2 + EPS)
                          * g2_ref[...] + b2_ref[...])

    return kernel


def _estimate_vmem(p_pad: int, c1: int, tc: int, c3: int) -> int:
    """Rough VMEM footprint with default double-buffering of in/out blocks."""
    bf, f4 = 2, 4
    per_buf = (p_pad * c1 * bf          # a (resident)
               + p_pad * tc * bf        # residual tile
               + p_pad * 1 * f4         # mask
               + c1 * tc * bf           # w1 tile
               + tc * c3 * bf           # w2 tile
               + 2 * tc * f4            # gamma1/beta1 tiles
               + 2 * c3 * f4            # gamma2/beta2
               + p_pad * c3 * f4)       # output block
    return 2 * per_buf + p_pad * c3 * f4  # + persistent f32 accumulator


def _pick_c2_tile(c2: int, p_pad: int, c1: int, c3: int) -> int:
    """Largest C2 tile (fewest grid steps, longest contiguous w1 DMA rows)
    that divides C2 and fits the VMEM budget."""
    for t in (1024, 512, 256, 128):
        if c2 % t == 0 and _estimate_vmem(p_pad, c1, t, c3) <= _VMEM_BUDGET:
            return t
    for t in (128, 256, 512, 1024):     # smallest legal fallback
        if c2 % t == 0:
            return t
    return c2


def fused_block(a_bf16, r_bf16, mask_f32, w1, g1, b1, w2, g2, b2,
                *, p_true: int):
    """a_bf16: (Pp, C1) bf16, r_bf16: (Pp, C2) bf16, mask_f32: (Pp, 1) f32,
    weights bf16, BN params f32."""
    p_pad, c1 = a_bf16.shape
    c2 = w1.shape[1]
    c3 = w2.shape[1]
    tc = _pick_c2_tile(c2, p_pad, c1, c3)
    n_steps = c2 // tc

    kernel = _make_kernel(p_true)

    return pl.pallas_call(
        kernel,
        out_shape=jax.ShapeDtypeStruct((p_pad, c3), jnp.float32),
        grid=(n_steps,),
        in_specs=[
            pl.BlockSpec((p_pad, c1), lambda j: (0, 0)),   # a (resident)
            pl.BlockSpec((p_pad, tc), lambda j: (0, j)),   # residual tile
            pl.BlockSpec((p_pad, 1), lambda j: (0, 0)),    # row mask (resident)
            pl.BlockSpec((c1, tc), lambda j: (0, j)),      # w1 tile
            pl.BlockSpec((1, tc), lambda j: (0, j)),       # gamma1 tile
            pl.BlockSpec((1, tc), lambda j: (0, j)),       # beta1 tile
            pl.BlockSpec((tc, c3), lambda j: (j, 0)),      # w2 tile
            pl.BlockSpec((1, c3), lambda j: (0, 0)),       # gamma2
            pl.BlockSpec((1, c3), lambda j: (0, 0)),       # beta2
        ],
        out_specs=pl.BlockSpec((p_pad, c3), lambda j: (0, 0)),
        scratch_shapes=[pltpu.VMEM((p_pad, c3), jnp.float32)],
        compiler_params=pltpu.CompilerParams(
            # single grid axis is the C2 reduction -> output revisited
            dimension_semantics=("arbitrary",),
            vmem_limit_bytes=_VMEM_LIMIT),
    )(a_bf16, r_bf16, mask_f32, w1, g1, b1, w2, g2, b2)


@jax.jit
def module_forward(x140, x148, params):
    """Replicates M.forward (training-mode batchnorm) on NCHW tensors."""
    w1, g1, b1, w2, g2, b2 = params
    n, c1, _, _ = x140.shape
    # 1x1 conv with stride 2 == spatial subsample then channel matmul.
    xs = x140[:, :, ::2, ::2]                              # (N, C1, Ho, Wo)
    ho, wo = xs.shape[2], xs.shape[3]
    p_true = n * ho * wo
    c2 = x148.shape[1]
    c3 = w2.shape[1]

    # Cast fused into the transpose (single pass) -- bf16 matmul/residual feed.
    a = jnp.transpose(xs, (0, 2, 3, 1)).reshape(p_true, c1).astype(jnp.bfloat16)
    r = jnp.transpose(x148, (0, 2, 3, 1)).reshape(p_true, c2).astype(jnp.bfloat16)

    # Pad pixel rows to a multiple of 16 (bf16 sublane packing); BN masks them.
    p_pad = ((p_true + 15) // 16) * 16
    if p_pad != p_true:
        a = jnp.pad(a, ((0, p_pad - p_true), (0, 0)))
        r = jnp.pad(r, ((0, p_pad - p_true), (0, 0)))
    mask = (jnp.arange(p_pad, dtype=jnp.int32) < p_true
            ).astype(jnp.float32).reshape(p_pad, 1)

    out_flat = fused_block(
        a, r, mask,
        w1.astype(jnp.bfloat16), g1, b1,
        w2.astype(jnp.bfloat16), g2, b2,
        p_true=p_true)

    out = out_flat[:p_true].reshape(n, ho, wo, c3)
    return jnp.transpose(out, (0, 3, 1, 2))                # back to NCHW


def reference_forward(x140, x148, params):
    """Pure-jnp reference mirroring the kernel's bf16 matmul/residual inputs."""
    w1, g1, b1, w2, g2, b2 = params
    xs = x140[:, :, ::2, ::2]
    n, c1, ho, wo = xs.shape
    a = jnp.transpose(xs, (0, 2, 3, 1)).reshape(-1, c1).astype(jnp.bfloat16)
    r = (jnp.transpose(x148, (0, 2, 3, 1)).reshape(-1, x148.shape[1])
         .astype(jnp.bfloat16).astype(jnp.float32))
    y1 = jnp.dot(a, w1.astype(jnp.bfloat16),
                 preferred_element_type=jnp.float32)
    m1 = y1.mean(0, keepdims=True)
    v1 = ((y1 - m1) ** 2).mean(0, keepdims=True)
    y1n = (y1 - m1) * jax.lax.rsqrt(v1 + EPS) * g1 + b1
    z = jnp.maximum(r + y1n, 0.0)
    y2 = jnp.dot(z.astype(jnp.bfloat16), w2.astype(jnp.bfloat16),
                 preferred_element_type=jnp.float32)
    m2 = y2.mean(0, keepdims=True)
    v2 = ((y2 - m2) ** 2).mean(0, keepdims=True)
    out = (y2 - m2) * jax.lax.rsqrt(v2 + EPS) * g2 + b2
    out = out.reshape(n, ho, wo, w2.shape[1])
    return jnp.transpose(out, (0, 3, 1, 2))


if __name__ == "__main__":
    # Small shapes consistent with the module's structure:
    #   conv2d46: C1 -> C2, 1x1 stride 2 ; conv2d47: C2 -> C1, 1x1 stride 1
    # Real module: C1=1024, C2=2048, 14x14 spatial; here scaled-down channels,
    # same 14x14 spatial so that P=98 exercises the row-padding/masking path.
    N, C1, C2, H, W = 2, 128, 256, 14, 14
    Ho, Wo = H // 2, W // 2
    C3 = C1

    key = jax.random.PRNGKey(0)
    k = jax.random.split(key, 8)
    x140 = jax.random.normal(k[0], (N, C1, H, W), dtype=jnp.float32)
    x148 = jax.random.normal(k[1], (N, C2, Ho, Wo), dtype=jnp.float32)

    # Weights stored as [Cin, Cout] (transpose of PyTorch's (Cout, Cin, 1, 1)).
    w1 = jax.random.normal(k[2], (C1, C2), dtype=jnp.float32) * (C1 ** -0.5)
    w2 = jax.random.normal(k[3], (C2, C3), dtype=jnp.float32) * (C2 ** -0.5)
    g1 = 1.0 + 0.1 * jax.random.normal(k[4], (1, C2), dtype=jnp.float32)
    b1 = 0.1 * jax.random.normal(k[5], (1, C2), dtype=jnp.float32)
    g2 = 1.0 + 0.1 * jax.random.normal(k[6], (1, C3), dtype=jnp.float32)
    b2 = 0.1 * jax.random.normal(k[7], (1, C3), dtype=jnp.float32)
    params = (w1, g1, b1, w2, g2, b2)

    out = jax.block_until_ready(module_forward(x140, x148, params))
    ref = jax.block_until_ready(reference_forward(x140, x148, params))

    assert out.shape == (N, C3, Ho, Wo), out.shape
    assert jnp.allclose(out, ref, atol=2e-3, rtol=2e-3), (
        "mismatch vs reference: max abs err = %e"
        % float(jnp.max(jnp.abs(out - ref))))
    print("KERNEL_OK")
</pallas_src>

<mosaic_0001>
module attributes {stable_mosaic.version = 11 : i64} {
  func.func @kernel(%arg0: i32, %arg1: memref<112x128xbf16, #tpu.memory_space<vmem>>, %arg2: memref<112x256xbf16, #tpu.memory_space<vmem>>, %arg3: memref<112x1xf32, #tpu.memory_space<vmem>>, %arg4: memref<128x256xbf16, #tpu.memory_space<vmem>>, %arg5: memref<1x256xf32, #tpu.memory_space<vmem>>, %arg6: memref<1x256xf32, #tpu.memory_space<vmem>>, %arg7: memref<256x128xbf16, #tpu.memory_space<vmem>>, %arg8: memref<1x128xf32, #tpu.memory_space<vmem>>, %arg9: memref<1x128xf32, #tpu.memory_space<vmem>>, %arg10: memref<112x128xf32, #tpu.memory_space<vmem>>, %arg11: memref<112x128xf32, #tpu.memory_space<vmem>>) attributes {dimension_semantics = [#tpu.dimension_semantics<arbitrary>], iteration_bounds = array<i64: 1>, scalar_prefetch = 0 : i64, scratch_operands = 1 : i64, tpu.core_type = #tpu.core_type<tc>, window_params = [{pipeline_mode = #tpu.pipeline_mode<synchronous>, transform_indices = @transform_0, window_bounds = array<i64: 112, 128>}, {transform_indices = @transform_1, window_bounds = array<i64: 112, 256>}, {pipeline_mode = #tpu.pipeline_mode<synchronous>, transform_indices = @transform_2, window_bounds = array<i64: 112, 1>}, {transform_indices = @transform_3, window_bounds = array<i64: 128, 256>}, {transform_indices = @transform_4, window_bounds = array<i64: 1, 256>}, {transform_indices = @transform_5, window_bounds = array<i64: 1, 256>}, {transform_indices = @transform_6, window_bounds = array<i64: 256, 128>}, {pipeline_mode = #tpu.pipeline_mode<synchronous>, transform_indices = @transform_7, window_bounds = array<i64: 1, 128>}, {pipeline_mode = #tpu.pipeline_mode<synchronous>, transform_indices = @transform_8, window_bounds = array<i64: 1, 128>}, {pipeline_mode = #tpu.pipeline_mode<synchronous>, transform_indices = @transform_9, window_bounds = array<i64: 112, 128>}]} {
    %c0_i32 = arith.constant 0 : i32
    %0 = arith.cmpi eq, %arg0, %c0_i32 : i32
    %1 = arith.extui %0 : i1 to i32
    %c0_i32_0 = arith.constant 0 : i32
    %2 = arith.cmpi ne, %1, %c0_i32_0 : i32
    scf.if %2 {
      %cst_27 = arith.constant 0.000000e+00 : f32
      %45 = vector.broadcast %cst_27 : f32 to vector<112x128xf32>
      %c0_28 = arith.constant 0 : index
      %c0_29 = arith.constant 0 : index
      %46 = vector.load %arg11[%c0_28, %c0_29] : memref<112x128xf32, #tpu.memory_space<vmem>>, vector<112x128xf32>
      tpu.vector_store %arg11[%c0_28, %c0_29], %45 {strides = array<i32>} : memref<112x128xf32, #tpu.memory_space<vmem>>, vector<112x128xf32>,
    } else {
    }
    %c0 = arith.constant 0 : index
    %c0_1 = arith.constant 0 : index
    %3 = vector.load %arg3[%c0, %c0_1] : memref<112x1xf32, #tpu.memory_space<vmem>>, vector<112x1xf32>
    %c0_2 = arith.constant 0 : index
    %c0_3 = arith.constant 0 : index
    %4 = vector.load %arg1[%c0_2, %c0_3] : memref<112x128xbf16, #tpu.memory_space<vmem>>, vector<112x128xbf16>
    %c0_4 = arith.constant 0 : index
    %c0_5 = arith.constant 0 : index
    %5 = vector.load %arg4[%c0_4, %c0_5] : memref<128x256xbf16, #tpu.memory_space<vmem>>, vector<128x256xbf16>
    %cst = arith.constant dense<0.000000e+00> : vector<112x256xf32>
    %6 = tpu.matmul %4, %5, %cst {dimension_numbers = #tpu.dot_dimension_numbers<[1], [0], [0], [1], [0, 0, 1, 1], [], []>} : vector<112x128xbf16>, vector<128x256xbf16>, vector<112x256xf32> -> vector<112x256xf32>
    %cst_6 = arith.constant dense<0.000000e+00> : vector<256xf32>
    %7 = vector.multi_reduction <add>, %6, %cst_6 [0] : vector<112x256xf32> to vector<256xf32>
    %8 = vector.shape_cast %7 : vector<256xf32> to vector<1x256xf32>
    %cst_7 = arith.constant 0.0102040814 : f32
    %9 = vector.broadcast %cst_7 : f32 to vector<1x256xf32>
    %10 = arith.mulf %8, %9 : vector<1x256xf32>
    %11 = vector.broadcast %10 : vector<1x256xf32> to vector<112x256xf32>
    %12 = arith.subf %6, %11 : vector<112x256xf32>
    %13 = arith.mulf %12, %12 : vector<112x256xf32>
    %14 = vector.broadcast %3 : vector<112x1xf32> to vector<112x256xf32>
    %15 = arith.mulf %13, %14 : vector<112x256xf32>
    %cst_8 = arith.constant dense<0.000000e+00> : vector<256xf32>
    %16 = vector.multi_reduction <add>, %15, %cst_8 [0] : vector<112x256xf32> to vector<256xf32>
    %17 = vector.shape_cast %16 : vector<256xf32> to vector<1x256xf32>
    %cst_9 = arith.constant 0.0102040814 : f32
    %18 = vector.broadcast %cst_9 : f32 to vector<1x256xf32>
    %19 = arith.mulf %17, %18 : vector<1x256xf32>
    %cst_10 = arith.constant 9.99999974E-6 : f32
    %20 = vector.broadcast %cst_10 : f32 to vector<1x256xf32>
    %21 = arith.addf %19, %20 : vector<1x256xf32>
    %22 = math.rsqrt %21 : vector<1x256xf32>
    %23 = vector.broadcast %22 : vector<1x256xf32> to vector<112x256xf32>
    %24 = arith.mulf %12, %23 : vector<112x256xf32>
    %c0_11 = arith.constant 0 : index
    %c0_12 = arith.constant 0 : index
    %25 = vector.load %arg5[%c0_11, %c0_12] : memref<1x256xf32, #tpu.memory_space<vmem>>, vector<1x256xf32>
    %26 = vector.broadcast %25 : vector<1x256xf32> to vector<112x256xf32>
    %27 = arith.mulf %24, %26 : vector<112x256xf32>
    %c0_13 = arith.constant 0 : index
    %c0_14 = arith.constant 0 : index
    %28 = vector.load %arg6[%c0_13, %c0_14] : memref<1x256xf32, #tpu.memory_space<vmem>>, vector<1x256xf32>
    %29 = vector.broadcast %28 : vector<1x256xf32> to vector<112x256xf32>
    %30 = arith.addf %27, %29 : vector<112x256xf32>
    %c0_15 = arith.constant 0 : index
    %c0_16 = arith.constant 0 : index
    %31 = vector.load %arg2[%c0_15, %c0_16] : memref<112x256xbf16, #tpu.memory_space<vmem>>, vector<112x256xbf16>
    %32 = arith.extf %31 : vector<112x256xbf16> to vector<112x256xf32>
    %33 = arith.addf %32, %30 : vector<112x256xf32>
    %cst_17 = arith.constant 0.000000e+00 : f32
    %34 = vector.broadcast %cst_17 : f32 to vector<112x256xf32>
    %35 = arith.maximumf %33, %34 : vector<112x256xf32>
    %c0_18 = arith.constant 0 : index
    %c0_19 = arith.constant 0 : index
    %36 = vector.load %arg11[%c0_18, %c0_19] : memref<112x128xf32, #tpu.memory_space<vmem>>, vector<112x128xf32>
    %37 = arith.truncf %35 : vector<112x256xf32> to vector<112x256xbf16>
    %c0_20 = arith.constant 0 : index
    %c0_21 = arith.constant 0 : index
    %38 = vector.load %arg7[%c0_20, %c0_21] : memref<256x128xbf16, #tpu.memory_space<vmem>>, vector<256x128xbf16>
    %cst_22 = arith.constant dense<0.000000e+00> : vector<112x128xf32>
    %39 = tpu.matmul %37, %38, %cst_22 {dimension_numbers = #tpu.dot_dimension_numbers<[1], [0], [0], [1], [0, 0, 1, 1], [], []>} : vector<112x256xbf16>, vector<256x128xbf16>, vector<112x128xf32> -> vector<112x128xf32>
    %40 = arith.addf %36, %39 : vector<112x128xf32>
    %c0_23 = arith.constant 0 : index
    %c0_24 = arith.constant 0 : index
    %41 = vector.load %arg11[%c0_23, %c0_24] : memref<112x128xf32, #tpu.memory_space<vmem>>, vector<112x128xf32>
    tpu.vector_store %arg11[%c0_23, %c0_24], %40 {strides = array<i32>} : memref<112x128xf32, #tpu.memory_space<vmem>>, vector<112x128xf32>,
    %c0_i32_25 = arith.constant 0 : i32
    %42 = arith.cmpi eq, %arg0, %c0_i32_25 : i32
    %43 = arith.extui %42 : i1 to i32
    %c0_i32_26 = arith.constant 0 : i32
    %44 = arith.cmpi ne, %43, %c0_i32_26 : i32
    scf.if %44 {
      %c0_27 = arith.constant 0 : index
      %c0_28 = arith.constant 0 : index
      %45 = vector.load %arg11[%c0_27, %c0_28] : memref<112x128xf32, #tpu.memory_space<vmem>>, vector<112x128xf32>
      %46 = vector.broadcast %3 : vector<112x1xf32> to vector<112x128xf32>
      %47 = arith.mulf %45, %46 : vector<112x128xf32>
      %cst_29 = arith.constant dense<0.000000e+00> : vector<128xf32>
      %48 = vector.multi_reduction <add>, %47, %cst_29 [0] : vector<112x128xf32> to vector<128xf32>
      %49 = vector.shape_cast %48 : vector<128xf32> to vector<1x128xf32>
      %cst_30 = arith.constant 0.0102040814 : f32
      %50 = vector.broadcast %cst_30 : f32 to vector<1x128xf32>
      %51 = arith.mulf %49, %50 : vector<1x128xf32>
      %52 = vector.broadcast %51 : vector<1x128xf32> to vector<112x128xf32>
      %53 = arith.subf %45, %52 : vector<112x128xf32>
      %54 = arith.mulf %53, %53 : vector<112x128xf32>
      %55 = vector.broadcast %3 : vector<112x1xf32> to vector<112x128xf32>
      %56 = arith.mulf %54, %55 : vector<112x128xf32>
      %cst_31 = arith.constant dense<0.000000e+00> : vector<128xf32>
      %57 = vector.multi_reduction <add>, %56, %cst_31 [0] : vector<112x128xf32> to vector<128xf32>
      %58 = vector.shape_cast %57 : vector<128xf32> to vector<1x128xf32>
      %cst_32 = arith.constant 0.0102040814 : f32
      %59 = vector.broadcast %cst_32 : f32 to vector<1x128xf32>
      %60 = arith.mulf %58, %59 : vector<1x128xf32>
      %cst_33 = arith.constant 9.99999974E-6 : f32
      %61 = vector.broadcast %cst_33 : f32 to vector<1x128xf32>
      %62 = arith.addf %60, %61 : vector<1x128xf32>
      %63 = math.rsqrt %62 : vector<1x128xf32>
      %64 = vector.broadcast %63 : vector<1x128xf32> to vector<112x128xf32>
      %65 = arith.mulf %53, %64 : vector<112x128xf32>
      %c0_34 = arith.constant 0 : index
      %c0_35 = arith.constant 0 : index
      %66 = vector.load %arg8[%c0_34, %c0_35] : memref<1x128xf32, #tpu.memory_space<vmem>>, vector<1x128xf32>
      %67 = vector.broadcast %66 : vector<1x128xf32> to vector<112x128xf32>
      %68 = arith.mulf %65, %67 : vector<112x128xf32>
      %c0_36 = arith.constant 0 : index
      %c0_37 = arith.constant 0 : index
      %69 = vector.load %arg9[%c0_36, %c0_37] : memref<1x128xf32, #tpu.memory_space<vmem>>, vector<1x128xf32>
      %70 = vector.broadcast %69 : vector<1x128xf32> to vector<112x128xf32>
      %71 = arith.addf %68, %70 : vector<112x128xf32>
      %c0_38 = arith.constant 0 : index
      %c0_39 = arith.constant 0 : index
      %72 = vector.load %arg10[%c0_38, %c0_39] : memref<112x128xf32, #tpu.memory_space<vmem>>, vector<112x128xf32>
      tpu.vector_store %arg10[%c0_38, %c0_39], %71 {strides = array<i32>} : memref<112x128xf32, #tpu.memory_space<vmem>>, vector<112x128xf32>,
    } else {
    }
    return
  }
  func.func @transform_0(%arg0: i32) -> (i32, i32) {
    %c0_i32 = arith.constant 0 : i32
    %c0_i32_0 = arith.constant 0 : i32
    %c0_i32_1 = arith.constant 0 : i32
    return %c0_i32, %c0_i32_0 : i32, i32
  }
  func.func @transform_1(%arg0: i32) -> (i32, i32) {
    %c0_i32 = arith.constant 0 : i32
    %c0_i32_0 = arith.constant 0 : i32
    return %c0_i32, %arg0 : i32, i32
  }
  func.func @transform_2(%arg0: i32) -> (i32, i32) {
    %c0_i32 = arith.constant 0 : i32
    %c0_i32_0 = arith.constant 0 : i32
    %c0_i32_1 = arith.constant 0 : i32
    return %c0_i32, %c0_i32_0 : i32, i32
  }
  func.func @transform_3(%arg0: i32) -> (i32, i32) {
    %c0_i32 = arith.constant 0 : i32
    %c0_i32_0 = arith.constant 0 : i32
    return %c0_i32, %arg0 : i32, i32
  }
  func.func @transform_4(%arg0: i32) -> (i32, i32) {
    %c0_i32 = arith.constant 0 : i32
    %c0_i32_0 = arith.constant 0 : i32
    return %c0_i32, %arg0 : i32, i32
  }
  func.func @transform_5(%arg0: i32) -> (i32, i32) {
    %c0_i32 = arith.constant 0 : i32
    %c0_i32_0 = arith.constant 0 : i32
    return %c0_i32, %arg0 : i32, i32
  }
  func.func @transform_6(%arg0: i32) -> (i32, i32) {
    %c0_i32 = arith.constant 0 : i32
    %c0_i32_0 = arith.constant 0 : i32
    return %arg0, %c0_i32 : i32, i32
  }
  func.func @transform_7(%arg0: i32) -> (i32, i32) {
    %c0_i32 = arith.constant 0 : i32
    %c0_i32_0 = arith.constant 0 : i32
    %c0_i32_1 = arith.constant 0 : i32
    return %c0_i32, %c0_i32_0 : i32, i32
  }
  func.func @transform_8(%arg0: i32) -> (i32, i32) {
    %c0_i32 = arith.constant 0 : i32
    %c0_i32_0 = arith.constant 0 : i32
    %c0_i32_1 = arith.constant 0 : i32
    return %c0_i32, %c0_i32_0 : i32, i32
  }
  func.func @transform_9(%arg0: i32) -> (i32, i32) {
    %c0_i32 = arith.constant 0 : i32
    %c0_i32_0 = arith.constant 0 : i32
    %c0_i32_1 = arith.constant 0 : i32
    return %c0_i32, %c0_i32_0 : i32, i32
  }
}

</mosaic_0001>

<bundles_post_ra>
// kernel: module_forward.1
= control target key start
LH: loop header
LB: loop body
LE: loop exit
PB: predicated region body
PF: predicated region fallthrough
CT: control target
= control target key end

     0   :  { %v1381_v1 = vmov 0   ;;  %s2317_s3 = inlined_call_operand.vmem [shape: bf16[128,256], index: 3, kind: input, shape index: {}]   ;;  %s2318_s0 = inlined_call_operand.vmem [shape: bf16[112,128], index: 0, kind: input, shape index: {}]   ;;  %s2319_s2 = inlined_call_operand.vmem [shape: f32[112,1], index: 2, kind: input, shape index: {}]   ;;  %s2320_s6 = inlined_call_operand.vmem [shape: bf16[256,128], index: 6, kind: input, shape index: {}]   ;;  %s2321_s4 = inlined_call_operand.vmem [shape: f32[1,256], index: 4, kind: input, shape index: {}]   ;;  %s2322_s5 = inlined_call_operand.vmem [shape: f32[1,256], index: 5, kind: input, shape index: {}]   ;;  %s2323_s1 = inlined_call_operand.vmem [shape: bf16[112,256], index: 1, kind: input, shape index: {}]   ;;  %s2324_s7 = inlined_call_operand.vmem [shape: f32[1,128], index: 7, kind: input, shape index: {}]   ;;  %s2325_s8 = inlined_call_operand.vmem [shape: f32[1,128], index: 8, kind: input, shape index: {}]   ;;  %s2326_s9 = inlined_call_operand.vmem [shape: f32[112,128], index: 9, kind: output, shape index: {}]  }
   0x1   :  { %v1328_v0 = vld [vmem:[%s2317_s3 + $0x4] ss:$8 sps:$4 sm:$0xff]   ;;  %249 = vmatprep.mubr.bf16.mxu0 %v1381_v1  ;;  %1326 = vset.pattern.permute.xlu0 %v1381_v1  ;;  %v1330_v2 = vld [vmem:[%s2317_s3] ss:$8 sps:$4 sm:$0xff]   ;;  %v1331_v3 = vld [vmem:[%s2317_s3 + $0x14] ss:$8 sps:$4 sm:$0xff]  }
   0x2   :  { %1327 = vset.pattern.permute.xlu1 %v1381_v1  ;;  %217 = vmatprep.subr.bf16.mxu0 %v1328_v0  ;;  %v1333_v4 = vld [vmem:[%s2317_s3 + $0x10] ss:$8 sps:$4 sm:$0xff]   ;;  %v1334_v5 = vld [vmem:[%s2317_s3 + $0x24] ss:$8 sps:$4 sm:$0xff]   ;;  %v1336_v6 = vld [vmem:[%s2317_s3 + $0x20] ss:$8 sps:$4 sm:$0xff]  }
   0x3   :  { %218 = vmatpush1.bf16.msra.mxu0 %v1330_v2  ;;  %v1337_v7 = vld [vmem:[%s2317_s3 + $0x34] ss:$8 sps:$4 sm:$0xff]   ;;  %v1339_v8 = vld [vmem:[%s2317_s3 + $0x30] ss:$8 sps:$4 sm:$0xff]   ;;  %v1340_v9 = vld [vmem:[%s2317_s3 + $0x44] ss:$8 sps:$4 sm:$0xff]  }
   0x4   :  { %219 = vmatprep.subr.bf16.mxu0 %v1331_v3  ;;  %v1342_v10 = vld [vmem:[%s2317_s3 + $0x40] ss:$8 sps:$4 sm:$0xff]   ;;  %v1343_v11 = vld [vmem:[%s2317_s3 + $0x54] ss:$8 sps:$4 sm:$0xff]   ;;  %v1345_v14 = vld [vmem:[%s2317_s3 + $0x50] ss:$8 sps:$4 sm:$0xff]  }
   0x5   :  { %v51_v12 = vld [vmem:[%s2319_s2] sm:$0xff]  ;;  %v53_v13 = vld [vmem:[%s2319_s2 + $0x10] sm:$0xff]  ;;  %v52_v15 = vld [vmem:[%s2319_s2 + $0x8] sm:$0xff] }
   0x6   :  { %418 = vperm.xlu0 %1326, %v51_v12   ;;  %428 = vperm.xlu1 %1327, %v53_v13   ;;  %v1346_v16 = vld [vmem:[%s2317_s3 + $0x64] ss:$8 sps:$4 sm:$0xff]   ;;  %v54_v17 = vld [vmem:[%s2319_s2 + $0x18] sm:$0xff]  ;;  %v1348_v18 = vld [vmem:[%s2317_s3 + $0x60] ss:$8 sps:$4 sm:$0xff]  }
   0x7   :  { %220 = vmatpush1.bf16.msra.mxu0 %v1333_v4  ;;  %v55_v19 = vld [vmem:[%s2319_s2 + $0x20] sm:$0xff]  ;;  %v1349_v20 = vld [vmem:[%s2317_s3 + $0x74] ss:$8 sps:$4 sm:$0xff]   ;;  %v56_v21 = vld [vmem:[%s2319_s2 + $0x28] sm:$0xff] }
   0x8   :  { %221 = vmatprep.subr.bf16.mxu0 %v1334_v5  ;;  %v1351_v22 = vld [vmem:[%s2317_s3 + $0x70] ss:$8 sps:$4 sm:$0xff]   ;;  %v1352_v25 = vld [vmem:[%s2318_s0] sm:$0xff]   ;;  %v60_v27 = vld [vmem:[%s2319_s2 + $0x48] sm:$0xff] }
   0x9   :  { %v57_v23 = vld [vmem:[%s2319_s2 + $0x30] sm:$0xff]  ;;  %v58_v24 = vld [vmem:[%s2319_s2 + $0x38] sm:$0xff]  ;;  %v59_v26 = vld [vmem:[%s2319_s2 + $0x40] sm:$0xff] }
   0xa   :  { %423 = vperm.xlu0 %1326, %v52_v15   ;;  %433 = vperm.xlu1 %1327, %v54_v17   ;;  %v61_v28 = vld [vmem:[%s2319_s2 + $0x50] sm:$0xff]  ;;  %v62_v29 = vld [vmem:[%s2319_s2 + $0x58] sm:$0xff]  ;;  %v1353_v30 = vld [vmem:[%s2318_s0 + $0x8] sm:$0xff]  }
   0xb   :  { %222 = vmatpush1.bf16.msra.mxu0 %v1336_v6  ;;  %v63_v31 = vld [vmem:[%s2319_s2 + $0x60] sm:$0xff]  ;;  %v64_v32 = vld [vmem:[%s2319_s2 + $0x68] sm:$0xff]  ;;  %v1354_v33 = vld [vmem:[%s2318_s0 + $0x10] sm:$0xff]  }
   0xc   :  { %223 = vmatprep.subr.bf16.mxu0 %v1337_v7  ;;  %v1355_v34 = vld [vmem:[%s2318_s0 + $0x18] sm:$0xff]   ;;  %v1356_v35 = vld [vmem:[%s2318_s0 + $0x20] sm:$0xff]   ;;  %v1357_v36 = vld [vmem:[%s2318_s0 + $0x28] sm:$0xff]  }
   0xd   :  { %v1358_v37 = vld [vmem:[%s2318_s0 + $0x30] sm:$0xff]   ;;  %v1359_v38 = vld [vmem:[%s2320_s6 + $0x40] sm:$0xff]   ;;  %v1361_v40 = vld [vmem:[%s2320_s6 + $0x48] sm:$0xff]  }
   0xe   :  { %438 = vperm.xlu0 %1326, %v55_v19   ;;  %443 = vperm.xlu1 %1327, %v56_v21   ;;  %v1360_v39 = vld [vmem:[%s2320_s6] sm:$0xff]   ;;  %v1362_v41 = vld [vmem:[%s2320_s6 + $0x8] sm:$0xff]   ;;  %v1363_v42 = vld [vmem:[%s2320_s6 + $0x50] sm:$0xff]  }
   0xf   :  { %224 = vmatpush1.bf16.msra.mxu0 %v1339_v8  ;;  %1267 = vmatprep.subr.bf16.mxu1 %v1359_v38  ;;  %v1364_v44 = vld [vmem:[%s2320_s6 + $0x10] sm:$0xff]   ;;  %v1365_v46 = vld [vmem:[%s2320_s6 + $0x58] sm:$0xff]   ;;  %v1367_v52 = vld [vmem:[%s2320_s6 + $0x60] sm:$0xff]  }
  0x10   :  { %225 = vmatprep.subr.bf16.mxu0 %v1340_v9  ;;  %1268 = vmatpush3.bf16.msra.mxu1 %v1360_v39  ;;  %v1366_v51 = vld [vmem:[%s2320_s6 + $0x18] sm:$0xff]   ;;  %v1368_v54 = vld [vmem:[%s2320_s6 + $0x20] sm:$0xff]   ;;  %v1369_v57 = vld [vmem:[%s2320_s6 + $0x68] sm:$0xff]  }
  0x11   :  { %1269 = vmatprep.subr.bf16.mxu1 %v1361_v40  ;;  %v1370_v63 = vld [vmem:[%s2320_s6 + $0x28] sm:$0xff]   ;;  %v1371_v0 = vld [vmem:[%s2320_s6 + $0x70] sm:$0xff]   ;;  %v1373_v5 = vld [vmem:[%s2320_s6 + $0x78] sm:$0xff]  }
  0x12   :  { %448 = vperm.xlu0 %1326, %v57_v23   ;;  %453 = vperm.xlu1 %1327, %v58_v24   ;;  %v1372_v2 = vld [vmem:[%s2320_s6 + $0x30] sm:$0xff]  }
  0x13   :  { %226 = vmatpush1.bf16.msra.mxu0 %v1342_v10 }
  0x14   :  { %227 = vmatprep.subr.bf16.mxu0 %v1343_v11  ;;  %1270 = vmatpush3.bf16.msra.mxu1 %v1362_v41  ;;  %v1374_v11 = vld [vmem:[%s2320_s6 + $0x38] sm:$0xff]  }
  0x15   :  { %1271 = vmatprep.subr.bf16.mxu1 %v1363_v42 }
  0x16   :  { %458 = vperm.xlu0 %1326, %v59_v26   ;;  %463 = vperm.xlu1 %1327, %v60_v27  }
  0x17   :  { %228 = vmatpush1.bf16.msra.mxu0 %v1345_v14 }
  0x18   :  { %229 = vmatprep.subr.bf16.mxu0 %v1346_v16  ;;  %1272 = vmatpush3.bf16.msra.mxu1 %v1364_v44 }
  0x19   :  { %1273 = vmatprep.subr.bf16.mxu1 %v1365_v46 }
  0x1a   :  { %468 = vperm.xlu0 %1326, %v61_v28   ;;  %473 = vperm.xlu1 %1327, %v62_v29  }
  0x1b   :  { %230 = vmatpush1.bf16.msra.mxu0 %v1348_v18 }
  0x1c   :  { %231 = vmatprep.subr.bf16.mxu0 %v1349_v20  ;;  %1274 = vmatpush3.bf16.msra.mxu1 %v1366_v51 }
  0x1d   :  { %1275 = vmatprep.subr.bf16.mxu1 %v1367_v52 }
  0x1e   :  { %478 = vperm.xlu0 %1326, %v63_v31   ;;  %483 = vperm.xlu1 %1327, %v64_v32  }
  0x1f   :  { %232 = vmatpush1.bf16.msra.mxu0 %v1351_v22 }
  0x20   :  { %1276 = vmatpush3.bf16.msra.mxu1 %v1368_v54 }
  0x21   :  { %1277 = vmatprep.subr.bf16.mxu1 %v1369_v57 }
  0x22   :  { %250 = vmatmul.mubr.bf16.vlgmr.msra.gmra.mrb[0].mxu0 %v1352_v25 }
  0x23   :  { %259 = vmatprep.mubr.bf16.mxu0 %v1381_v1 }
  0x24   :  { %1278 = vmatpush3.bf16.msra.mxu1 %v1370_v63 }
  0x25   :  { %1279 = vmatprep.subr.bf16.mxu1 %v1371_v0 }
  0x28   :  { %1280 = vmatpush3.bf16.msra.mxu1 %v1372_v2 }
  0x29   :  { %1281 = vmatprep.subr.bf16.mxu1 %v1373_v5 }
  0x2a   :  { %260 = vmatmul.mubr.bf16.gmra.mrb[4].mxu0 %v1353_v30 }
  0x2b   :  { %269 = vmatprep.mubr.bf16.mxu0 %v1381_v1 }
  0x2c   :  { %1282 = vmatpush3.bf16.msra.mxu1 %v1374_v11 }
  0x32   :  { %270 = vmatmul.mubr.bf16.gmra.mrb[8].mxu0 %v1354_v33 }
  0x33   :  { %279 = vmatprep.mubr.bf16.mxu0 %v1381_v1 }
  0x3a   :  { %280 = vmatmul.mubr.bf16.gmra.mrb[12].mxu0 %v1355_v34 }
  0x3b   :  { %289 = vmatprep.mubr.bf16.mxu0 %v1381_v1 }
  0x42   :  { %290 = vmatmul.mubr.bf16.gmra.mrb[16].mxu0 %v1356_v35 }
  0x43   :  { %299 = vmatprep.mubr.bf16.mxu0 %v1381_v1 }
  0x4a   :  { %300 = vmatmul.mubr.bf16.gmra.mrb[20].mxu0 %v1357_v36 }
  0x4b   :  { %309 = vmatprep.mubr.bf16.mxu0 %v1381_v1 }
  0x52   :  { %310 = vmatmul.mubr.bf16.gmra.mrb[24].mxu0 %v1358_v37 }
  0x85   :  { %v1678_v51 = vpop.permute.xlu0 %418  ;;  %v1680_v52 = vpop.permute.xlu1 %428 }
  0x86   :  { %2351 = vst [vmem:[#allocation3_spill] sm:$0xff] %v1680_v52 }
  0x89   :  { %v1682_v63 = vpop.permute.xlu0 %423  ;;  %v1684_v0 = vpop.permute.xlu1 %433 }
  0x8a   :  { %2352 = vst [vmem:[#allocation4_spill] sm:$0xff] %v1684_v0 }
  0xf5   :  { %v1567_v43 = vpop.f32.mrb[0].mxu0 }
  0xf6   :  { %v1572_v45 = vpop.f32.mrb[1].mxu0 }
  0xf7   :  { %v1577_v47 = vpop.f32.mrb[2].mxu0 }
  0xf8   :  { %v320_v48 = vadd.f32 %v1577_v47, %v1567_v43  ;;  %v1581_v49 = vpop.f32.mrb[3].mxu0 }
  0xf9   :  { %v339_v50 = vadd.f32 %v1581_v49, %v1572_v45 }
  0xfd   :  { %v1591_v53 = vpop.f32.mrb[4].mxu0 }
  0xfe   :  { %v321_v55 = vadd.f32 %v320_v48, %v1591_v53  ;;  %v1597_v56 = vpop.f32.mrb[5].mxu0 }
  0xff   :  { %v340_v58 = vadd.f32 %v339_v50, %v1597_v56  ;;  %v1603_v59 = vpop.f32.mrb[6].mxu0 }
 0x100   :  { %v322_v60 = vadd.f32 %v321_v55, %v1603_v59  ;;  %v1606_v61 = vpop.f32.mrb[7].mxu0 }
 0x101   :  { %v341_v62 = vadd.f32 %v340_v58, %v1606_v61 }
 0x105   :  { %v1615_v1 = vpop.f32.mrb[8].mxu0 }
 0x106   :  { %v323_v3 = vadd.f32 %v322_v60, %v1615_v1  ;;  %v1621_v4 = vpop.f32.mrb[9].mxu0 }
 0x107   :  { %v342_v6 = vadd.f32 %v341_v62, %v1621_v4  ;;  %v1627_v7 = vpop.f32.mrb[10].mxu0 }
 0x108   :  { %v324_v8 = vadd.f32 %v323_v3, %v1627_v7  ;;  %v1630_v9 = vpop.f32.mrb[11].mxu0 }
 0x109   :  { %v343_v10 = vadd.f32 %v342_v6, %v1630_v9 }
 0x10d   :  { %v1636_v12 = vpop.f32.mrb[12].mxu0 }
 0x10e   :  { %v325_v13 = vadd.f32 %v324_v8, %v1636_v12  ;;  %v1639_v14 = vpop.f32.mrb[13].mxu0 }
 0x10f   :  { %v344_v15 = vadd.f32 %v343_v10, %v1639_v14  ;;  %v1642_v16 = vpop.f32.mrb[14].mxu0 }
 0x110   :  { %v326_v17 = vadd.f32 %v325_v13, %v1642_v16  ;;  %v1645_v18 = vpop.f32.mrb[15].mxu0 }
 0x111   :  { %v345_v19 = vadd.f32 %v344_v15, %v1645_v18 }
 0x115   :  { %v1648_v20 = vpop.f32.mrb[16].mxu0 }
 0x116   :  { %v327_v21 = vadd.f32 %v326_v17, %v1648_v20  ;;  %v1651_v22 = vpop.f32.mrb[17].mxu0  ;;  %v1705_v17 = vpop.permute.xlu0 %438 }
 0x117   :  { %v346_v23 = vadd.f32 %v345_v19, %v1651_v22  ;;  %v1654_v24 = vpop.f32.mrb[18].mxu0  ;;  %2353 = vst [vmem:[#allocation5_spill] sm:$0xff] %v1705_v17 }
 0x118   :  { %v328_v25 = vadd.f32 %v327_v21, %v1654_v24  ;;  %v1657_v26 = vpop.f32.mrb[19].mxu0 }
 0x119   :  { %v347_v27 = vadd.f32 %v346_v23, %v1657_v26  ;;  %v1718_v23 = vpop.permute.xlu1 %443 }
 0x11a   :  { %2354 = vst [vmem:[#allocation6_spill] sm:$0xff] %v1718_v23 }
 0x11d   :  { %v1660_v28 = vpop.f32.mrb[20].mxu0 }
 0x11e   :  { %v329_v29 = vadd.f32 %v328_v25, %v1660_v28  ;;  %v1663_v30 = vpop.f32.mrb[21].mxu0 }
 0x11f   :  { %v348_v31 = vadd.f32 %v347_v27, %v1663_v30  ;;  %v1666_v32 = vpop.f32.mrb[22].mxu0 }
 0x120   :  { %v330_v33 = vadd.f32 %v329_v29, %v1666_v32  ;;  %v1669_v34 = vpop.f32.mrb[23].mxu0 }
 0x121   :  { %v349_v35 = vadd.f32 %v348_v31, %v1669_v34 }
 0x125   :  { %v1672_v36 = vpop.f32.mrb[24].mxu0 }
 0x126   :  { %v331_v37 = vadd.f32 %v330_v33, %v1672_v36  ;;  %v1675_v38 = vpop.f32.mrb[25].mxu0 }
 0x127   :  { %v350_v39 = vadd.f32 %v349_v35, %v1675_v38  ;;  %v315_v40 = vpop.f32.mrb[26].mxu0 }
 0x128   :  { %v332_v41 = vadd.f32 %v331_v37, %v315_v40  ;;  %v317_v42 = vpop.f32.mrb[27].mxu0 }
 0x129   :  { %v351_v44 = vadd.f32 %v350_v39, %v317_v42 }
 0x12a   :  { %v333_v46 = vrot.slane %v332_v41, 4 }
 0x12b   :  { %v352_v48 = vrot.slane %v351_v44, 4 }
 0x12c   :  { %v334_v50 = vadd.f32 %v333_v46, %v332_v41  ;;  %v1770_v46 = vpop.permute.xlu1 %453 }
 0x12d   :  { %v353_v54 = vadd.f32 %v352_v48, %v351_v44  ;;  %v1768_v44 = vpop.permute.xlu0 %448  ;;  %2356 = vst [vmem:[#allocation8_spill] sm:$0xff] %v1770_v46 }
 0x12e   :  { %v335_v55 = vrot.slane %v334_v50, 2  ;;  %2355 = vst [vmem:[#allocation7_spill] sm:$0xff] %v1768_v44 }
 0x12f   :  { %v354_v57 = vrot.slane %v353_v54, 2 }
 0x130   :  { %v336_v58 = vadd.f32 %v335_v55, %v334_v50 }
 0x131   :  { %v355_v60 = vadd.f32 %v354_v57, %v353_v54 }
 0x132   :  { %v337_v62 = vrot.slane %v336_v58, 1 }
 0x133   :  { %v356_v2 = vrot.slane %v355_v60, 1 }
 0x134   :  { %v338_v3 = vadd.f32 %v337_v62, %v336_v58 }
 0x135   :  { %v357_v5 = vadd.f32 %v356_v2, %v355_v60 }
 0x136   :  { %v1686_v6 = vmul.f32 0.010204081, %v338_v3 }
 0x137   :  { %v1688_v8 = vmul.f32 0.010204081, %v357_v5 }
 0x138   :  { %v1691_v10 = vsub.f32 %v315_v40, %v1686_v6  ;;  %v1695_v11 = vsub.f32 %v1567_v43, %v1686_v6  ;;  %v1699_v13 = vsub.f32 %v1577_v47, %v1686_v6  ;;  %v1703_v15 = vsub.f32 %v1591_v53, %v1686_v6 }
 0x139   :  { %v1709_v19 = vsub.f32 %v1603_v59, %v1686_v6  ;;  %v1713_v21 = vsub.f32 %v1615_v1, %v1686_v6  ;;  %v1716_v43 = vsub.f32 %v317_v42, %v1688_v8  ;;  %v1722_v47 = vsub.f32 %v1572_v45, %v1688_v8 }
 0x13a   :  { %v388_v53 = vmul.f32 %v1695_v11, %v1695_v11  ;;  %v390_v59 = vmul.f32 %v1699_v13, %v1699_v13  ;;  %v392_v25 = vmul.f32 %v1703_v15, %v1703_v15  ;;  %v1734_v27 = vsub.f32 %v1581_v49, %v1688_v8 }
 0x13b   :  { %v394_v1 = vmul.f32 %v1709_v19, %v1709_v19  ;;  %v396_v45 = vmul.f32 %v1713_v21, %v1713_v21  ;;  %v1742_v33 = vsub.f32 %v1597_v56, %v1688_v8  ;;  %v1747_v37 = vsub.f32 %v1606_v61, %v1688_v8 }
 0x13c   :  { %v486_v29 = vmul.f32 %v1678_v51, %v388_v53  ;;  %v488_v31 = vmul.f32 %v1682_v63, %v390_v59  ;;  %v490_v35 = vmul.f32 %v1680_v52, %v392_v25  ;;  %v1751_v49 = vsub.f32 %v1621_v4, %v1688_v8 }
 0x13d   :  { %v1755_v40 = vsub.f32 %v1627_v7, %v1686_v6  ;;  %v1759_v41 = vsub.f32 %v1630_v9, %v1688_v8  ;;  %v389_v56 = vmul.f32 %v1722_v47, %v1722_v47  ;;  %v492_v42 = vmul.f32 %v1684_v0, %v394_v1 }
 0x13e   :  { %v514_v39 = vadd.f32 %v488_v31, %v486_v29  ;;  %v391_v61 = vmul.f32 %v1734_v27, %v1734_v27  ;;  %v393_v4 = vmul.f32 %v1742_v33, %v1742_v33  ;;  %v494_v7 = vmul.f32 %v1705_v17, %v396_v45 }
 0x13f   :  { %v398_v9 = vmul.f32 %v1755_v40, %v1755_v40  ;;  %v487_v50 = vmul.f32 %v1678_v51, %v389_v56  ;;  %v395_v54 = vmul.f32 %v1747_v37, %v1747_v37  ;;  %v397_v55 = vmul.f32 %v1751_v49, %v1751_v49 }
 0x140   :  { %v515_v48 = vadd.f32 %v514_v39, %v490_v35  ;;  %v399_v57 = vmul.f32 %v1759_v41, %v1759_v41  ;;  %v489_v58 = vmul.f32 %v1682_v63, %v391_v61  ;;  %v491_v62 = vmul.f32 %v1680_v52, %v393_v4  ;;  %v1816_v35 = vpop.permute.xlu1 %463 }
 0x141   :  { %v496_v2 = vmul.f32 %v1718_v23, %v398_v9  ;;  %v1787_v3 = vsub.f32 %v1636_v12, %v1686_v6  ;;  %v1791_v53 = vsub.f32 %v1639_v14, %v1688_v8  ;;  %v1795_v59 = vsub.f32 %v1642_v16, %v1686_v6  ;;  %2358 = vst [vmem:[#allocation10_spill] sm:$0xff] %v1816_v35 }
 0x142   :  { %v516_v60 = vadd.f32 %v515_v48, %v492_v42  ;;  %v533_v5 = vadd.f32 %v489_v58, %v487_v50  ;;  %v1799_v25 = vsub.f32 %v1645_v18, %v1688_v8  ;;  %v1805_v12 = vsub.f32 %v1648_v20, %v1686_v6  ;;  %v1814_v18 = vpop.permute.xlu0 %458 }
 0x143   :  { %v400_v45 = vmul.f32 %v1787_v3, %v1787_v3  ;;  %v1809_v14 = vsub.f32 %v1651_v22, %v1688_v8  ;;  %v493_v29 = vmul.f32 %v1684_v0, %v395_v54  ;;  %v402_v31 = vmul.f32 %v1795_v59, %v1795_v59  ;;  %2357 = vst [vmem:[#allocation9_spill] sm:$0xff] %v1814_v18 }
 0x144   :  { %v517_v1 = vadd.f32 %v516_v60, %v494_v7  ;;  %v534_v16 = vadd.f32 %v533_v5, %v491_v62  ;;  %v495_v39 = vmul.f32 %v1705_v17, %v397_v55  ;;  %v404_v42 = vmul.f32 %v1805_v12, %v1805_v12 }
 0x145   :  { %v498_v20 = vmul.f32 %v1768_v44, %v400_v45  ;;  %v497_v22 = vmul.f32 %v1718_v23, %v399_v57  ;;  %v401_v4 = vmul.f32 %v1791_v53, %v1791_v53  ;;  %v403_v7 = vmul.f32 %v1799_v25, %v1799_v25 }
 0x146   :  { %v518_v56 = vadd.f32 %v517_v1, %v496_v2  ;;  %v535_v61 = vadd.f32 %v534_v16, %v493_v29  ;;  %v500_v9 = vmul.f32 %v1770_v46, %v402_v31  ;;  %v502_v50 = vmul.f32 %v1814_v18, %v404_v42  ;;  %v1862_v29 = vpop.permute.xlu1 %473 }
 0x147   :  { %v1831_v54 = vsub.f32 %v1654_v24, %v1686_v6  ;;  %v1835_v57 = vsub.f32 %v1657_v26, %v1688_v8  ;;  %v1839_v58 = vsub.f32 %v1660_v28, %v1686_v6  ;;  %v1843_v60 = vsub.f32 %v1663_v30, %v1688_v8  ;;  %v1858_v30 = vpop.permute.xlu0 %468  ;;  %2360 = vst [vmem:[#allocation12_spill] sm:$0xff] %v1862_v29 }
 0x148   :  { %v519_v48 = vadd.f32 %v518_v56, %v498_v20  ;;  %v536_v55 = vadd.f32 %v535_v61, %v495_v39  ;;  %v1849_v24 = vsub.f32 %v1666_v32, %v1686_v6  ;;  %v1853_v26 = vsub.f32 %v1669_v34, %v1688_v8  ;;  %2359 = vst [vmem:[#allocation11_spill] sm:$0xff] %v1858_v30 }
 0x149   :  { %v406_v2 = vmul.f32 %v1831_v54, %v1831_v54  ;;  %v499_v28 = vmul.f32 %v1768_v44, %v401_v4  ;;  %v405_v1 = vmul.f32 %v1809_v14, %v1809_v14  ;;  %v408_v45 = vmul.f32 %v1839_v58, %v1839_v58 }
 0x14a   :  { %v520_v62 = vadd.f32 %v519_v48, %v500_v9  ;;  %v537_v5 = vadd.f32 %v536_v55, %v497_v22  ;;  %v410_v34 = vmul.f32 %v1849_v24, %v1849_v24  ;;  %v501_v39 = vmul.f32 %v1770_v46, %v403_v7 }
 0x14b   :  { %v504_v32 = vmul.f32 %v1816_v35, %v406_v2  ;;  %v407_v56 = vmul.f32 %v1835_v57, %v1835_v57  ;;  %v506_v42 = vmul.f32 %v1858_v30, %v408_v45  ;;  %v1873_v22 = vsub.f32 %v1672_v36, %v1686_v6 }
 0x14c   :  { %v521_v16 = vadd.f32 %v520_v62, %v502_v50  ;;  %v538_v31 = vadd.f32 %v537_v5, %v499_v28  ;;  %v503_v4 = vmul.f32 %v1814_v18, %v405_v1  ;;  %v409_v48 = vmul.f32 %v1843_v60, %v1843_v60  ;;  %v1890_v5 = vpop.permute.xlu0 %478  ;;  %v1892_v28 = vpop.permute.xlu1 %483 }
 0x14d   :  { %v1880_v9 = vsub.f32 %v1675_v38, %v1688_v8  ;;  %v414_v7 = vmul.f32 %v1691_v10, %v1691_v10  ;;  %v508_v55 = vmul.f32 %v1862_v29, %v410_v34  ;;  %v412_v36 = vmul.f32 %v1873_v22, %v1873_v22  ;;  %2361 = vst [vmem:[#allocation13_spill] sm:$0xff] %v1890_v5 }
 0x14e   :  { %v522_v20 = vadd.f32 %v521_v16, %v504_v32  ;;  %v539_v61 = vadd.f32 %v538_v31, %v501_v39  ;;  %v505_v62 = vmul.f32 %v1816_v35, %v407_v56  ;;  %v411_v2 = vmul.f32 %v1853_v26, %v1853_v26  ;;  %2362 = vst [vmem:[#allocation14_spill] sm:$0xff] %v1892_v28 }
 0x14f   :  { %v510_v38 = vmul.f32 %v1890_v5, %v412_v36  ;;  %v507_v45 = vmul.f32 %v1858_v30, %v409_v48  ;;  %v413_v16 = vmul.f32 %v1880_v9, %v1880_v9  ;;  %v512_v34 = vmul.f32 %v1892_v28, %v414_v7 }
 0x150   :  { %v523_v50 = vadd.f32 %v522_v20, %v506_v42  ;;  %v540_v6 = vadd.f32 %v539_v61, %v503_v4  ;;  %v415_v31 = vmul.f32 %v1716_v43, %v1716_v43  ;;  %v509_v56 = vmul.f32 %v1862_v29, %v411_v2 }
 0x151   :  { %v511_v42 = vmul.f32 %v1890_v5, %v413_v16  ;;  %v588_v30 = vlaneseq }
 0x152   :  { %v524_v8 = vadd.f32 %v523_v50, %v508_v55  ;;  %v541_v1 = vadd.f32 %v540_v6, %v505_v62  ;;  %v513_v48 = vmul.f32 %v1892_v28, %v415_v31  ;;  %v586_v31 = vld [vmem:[%s2321_s4] sm:$0x3] }
 0x154   :  { %v525_v32 = vadd.f32 %v524_v8, %v510_v38  ;;  %v542_v39 = vadd.f32 %v541_v1, %v507_v45 }
 0x156   :  { %v526_v20 = vadd.f32 %v525_v32, %v512_v34  ;;  %v543_v61 = vadd.f32 %v542_v39, %v509_v56  ;;  %v589_v32 = vshrl.u32 %v588_v30, 7  ;;  %v1918_v30 = vld [vmem:[%s2323_s1 + $0x8] sm:$0xff] }
 0x158   :  { %v527_v4 = vrot.slane %v526_v20, 4  ;;  %v544_v50 = vadd.f32 %v543_v61, %v511_v42  ;;  %v590_v56 = vsub.s32 0, %v589_v32  ;;  %v626_v61 = vld [vmem:[%s2322_s5] sm:$0x3] }
 0x15a   :  { %v528_v55 = vadd.f32 %v527_v4, %v526_v20  ;;  %v545_v36 = vadd.f32 %v544_v50, %v513_v48  ;;  %v594_v20 = vsub.s32 1, %v589_v32  ;;  %v1920_v50 = vrot.slane %v586_v31, %v590_v56  ;;  %v1925_v48 = vld [vmem:[%s2323_s1 + $0x10] sm:$0xff] }
 0x15b   :  { %v1955_v32 = vld [vmem:[%s2323_s1 + $0x30] sm:$0xff] }
 0x15c   :  { %v529_v6 = vrot.slane %v528_v55, 2  ;;  %v546_v62 = vrot.slane %v545_v36, 4 }
 0x15e   :  { %v530_v38 = vadd.f32 %v529_v6, %v528_v55  ;;  %v547_v7 = vadd.f32 %v546_v62, %v545_v36  ;;  %v1930_v55 = vld [vmem:[%s2323_s1 + $0x18] sm:$0xff]  ;;  %v1932_v36 = vrot.slane %v586_v31, %v594_v20  ;;  %v1934_v6 = vrot.slane %v626_v61, %v590_v56  ;;  %v1969_v31 = vld [vmem:[%s2323_s1 + $0x40] sm:$0xff] }
 0x15f   :  { %v1936_v62 = vrot.slane %v626_v61, %v594_v20  ;;  %v684_v56 = vunpack.c.l.bf16 %v1925_v48  ;;  %v1974_v20 = vld [vmem:[%s2323_s1 + $0x48] sm:$0xff] }
 0x160   :  { %v531_v8 = vrot.slane %v530_v38, 1  ;;  %v548_v35 = vrot.slane %v547_v7, 2 }
 0x162   :  { %v532_v1 = vadd.f32 %v531_v8, %v530_v38  ;;  %v549_v45 = vadd.f32 %v548_v35, %v547_v7  ;;  %v1913_v35 = vld [vmem:[%s2323_s1] sm:$0xff]  ;;  %v1946_v7 = vld [vmem:[%s2323_s1 + $0x28] sm:$0xff] }
 0x163   :  { %v1941_v38 = vld [vmem:[%s2323_s1 + $0x20] sm:$0xff]  ;;  %v680_v8 = vunpack.c.l.bf16 %v1913_v35 }
 0x164   :  { %v552_v2 = vmul.f32 0.010204081, %v532_v1  ;;  %v550_v34 = vrot.slane %v549_v45, 1 }
 0x166   :  { %v554_v16 = vadd.f32 1e-05, %v552_v2  ;;  %v551_v39 = vadd.f32 %v550_v34, %v549_v45  ;;  %v682_v45 = vunpack.c.l.bf16 %v1918_v30  ;;  %v1960_v34 = vld [vmem:[%s2323_s1 + $0x38] sm:$0xff] }
 0x168   :  { %1375 = vrsqrt.f32 %v554_v16  ;;  %v553_v42 = vmul.f32 0.010204081, %v551_v39 }
 0x16a   :  { %v555_v4 = vadd.f32 1e-05, %v553_v42  ;;  %v686_v42 = vunpack.c.l.bf16 %v1930_v55 }
 0x16c   :  { %1377 = vrsqrt.f32 %v555_v4 }
 0x172   :  { %v1984_v29 = vpop.eup %1375 }
 0x173   :  { %v558_v16 = vmul.f32 %v1984_v29, %v1695_v11  ;;  %v560_v1 = vmul.f32 %v1984_v29, %v1699_v13  ;;  %v562_v2 = vmul.f32 %v1984_v29, %v1703_v15  ;;  %v564_v5 = vmul.f32 %v1984_v29, %v1709_v19 }
 0x174   :  { %v566_v18 = vmul.f32 %v1984_v29, %v1713_v21  ;;  %v568_v4 = vmul.f32 %v1984_v29, %v1755_v40  ;;  %v570_v39 = vmul.f32 %v1984_v29, %v1787_v3  ;;  %v572_v11 = vmul.f32 %v1984_v29, %v1795_v59 }
 0x175   :  { %v598_v13 = vmul.f32 %v1920_v50, %v558_v16  ;;  %v600_v61 = vmul.f32 %v1920_v50, %v560_v1  ;;  %v602_v15 = vmul.f32 %v1920_v50, %v562_v2  ;;  %v604_v19 = vmul.f32 %v1920_v50, %v564_v5 }
 0x176   :  { %v606_v28 = vmul.f32 %v1920_v50, %v566_v18  ;;  %v608_v21 = vmul.f32 %v1920_v50, %v568_v4  ;;  %v610_v40 = vmul.f32 %v1920_v50, %v570_v39  ;;  %v612_v46 = vmul.f32 %v1920_v50, %v572_v11  ;;  %v2014_v3 = vpop.eup %1377 }
 0x177   :  { %v638_v59 = vadd.f32 %v1934_v6, %v598_v13  ;;  %v640_v16 = vadd.f32 %v1934_v6, %v600_v61  ;;  %v642_v1 = vadd.f32 %v1934_v6, %v602_v15  ;;  %v644_v2 = vadd.f32 %v1934_v6, %v604_v19 }
 0x178   :  { %v559_v5 = vmul.f32 %v2014_v3, %v1722_v47  ;;  %v561_v18 = vmul.f32 %v2014_v3, %v1734_v27  ;;  %v563_v39 = vmul.f32 %v2014_v3, %v1742_v33  ;;  %v565_v4 = vmul.f32 %v2014_v3, %v1747_v37 }
 0x179   :  { %v708_v11 = vadd.f32 %v680_v8, %v638_v59  ;;  %v710_v13 = vadd.f32 %v682_v45, %v640_v16  ;;  %v712_v44 = vadd.f32 %v684_v56, %v642_v1  ;;  %v714_v61 = vadd.f32 %v686_v42, %v644_v2 }
 0x17a   :  { %v599_v15 = vmul.f32 %v1932_v36, %v559_v5  ;;  %v601_v19 = vmul.f32 %v1932_v36, %v561_v18  ;;  %v603_v23 = vmul.f32 %v1932_v36, %v563_v39  ;;  %v605_v47 = vmul.f32 %v1932_v36, %v565_v4 }
 0x17b   :  { %v736_v17 = vmax.f32 %v708_v11, 0.0  ;;  %v738_v27 = vmax.f32 %v710_v13, 0.0  ;;  %v740_v0 = vmax.f32 %v712_v44, 0.0  ;;  %v742_v52 = vmax.f32 %v714_v61, 0.0 }
 0x17c   :  { %v639_v33 = vadd.f32 %v1936_v62, %v599_v15  ;;  %v641_v37 = vadd.f32 %v1936_v62, %v601_v19  ;;  %v643_v8 = vadd.f32 %v1936_v62, %v603_v23  ;;  %v645_v45 = vadd.f32 %v1936_v62, %v605_v47 }
 0x17d   :  { %v778_v56 = vpack.c.bf16 %v738_v27, %v736_v17  ;;  %v2036_v42 = vpack.c.bf16 %v742_v52, %v740_v0  ;;  %v567_v59 = vmul.f32 %v2014_v3, %v1751_v49  ;;  %v569_v16 = vmul.f32 %v2014_v3, %v1759_v41 }
 0x17e   :  { %v2363_v44 = vunpack.c.h.bf16 %v1913_v35  ;;  %v2364_v2 = vunpack.c.h.bf16 %v1918_v30  ;;  %v2365_v18 = vunpack.c.h.bf16 %v1925_v48  ;;  %v2366_v39 = vunpack.c.h.bf16 %v1930_v55 }
 0x17f   :  { %v607_v52 = vmul.f32 %v1932_v36, %v567_v59  ;;  %v609_v0 = vmul.f32 %v1932_v36, %v569_v16  ;;  %v646_v49 = vadd.f32 %v1934_v6, %v606_v28  ;;  %v648_v41 = vadd.f32 %v1934_v6, %v608_v21 }
 0x180   :  { %v709_v1 = vadd.f32 %v2363_v44, %v639_v33  ;;  %v711_v5 = vadd.f32 %v2364_v2, %v641_v37  ;;  %v713_v23 = vadd.f32 %v2365_v18, %v643_v8  ;;  %v715_v17 = vadd.f32 %v2366_v39, %v645_v45 }
 0x181   :  { %v647_v30 = vadd.f32 %v1936_v62, %v607_v52  ;;  %v649_v48 = vadd.f32 %v1936_v62, %v609_v0  ;;  %v2367_v61 = vunpack.c.l.bf16 %v1941_v38  ;;  %v2368_v15 = vunpack.c.l.bf16 %v1946_v7 }
 0x182   :  { %v737_v4 = vmax.f32 %v709_v1, 0.0  ;;  %v739_v35 = vmax.f32 %v711_v5, 0.0  ;;  %v741_v11 = vmax.f32 %v713_v23, 0.0  ;;  %v743_v13 = vmax.f32 %v715_v17, 0.0 }
 0x183   :  { %v716_v55 = vadd.f32 %v2367_v61, %v646_v49  ;;  %v718_v19 = vadd.f32 %v2368_v15, %v648_v41  ;;  %v571_v28 = vmul.f32 %v2014_v3, %v1791_v53  ;;  %v573_v21 = vmul.f32 %v2014_v3, %v1799_v25 }
 0x184   :  { %v779_v47 = vpack.c.bf16 %v739_v35, %v737_v4  ;;  %v781_v27 = vpack.c.bf16 %v743_v13, %v741_v11  ;;  %v2369_v33 = vunpack.c.h.bf16 %v1941_v38  ;;  %v2370_v8 = vunpack.c.h.bf16 %v1946_v7 }
 0x185   :  { %v744_v59 = vmax.f32 %v716_v55, 0.0  ;;  %v746_v16 = vmax.f32 %v718_v19, 0.0  ;;  %v611_v44 = vmul.f32 %v1932_v36, %v571_v28  ;;  %v613_v1 = vmul.f32 %v1932_v36, %v573_v21  ;;  %v677_v21 = vld [vmem:[%s2323_s1 + $0x58] sm:$0xff] }
 0x186   :  { %v717_v37 = vadd.f32 %v2369_v33, %v647_v30  ;;  %v719_v45 = vadd.f32 %v2370_v8, %v649_v48  ;;  %952 = vmatprep.mubr.bf16.mxu1 %v779_v47  ;;  %v650_v2 = vadd.f32 %v1934_v6, %v610_v40  ;;  %v652_v53 = vadd.f32 %v1934_v6, %v612_v46 }
 0x187   :  { %953 = vmatmul.mubr.bf16.vlgmr.msra.gmra.mrb[0].mxu1 %v778_v56  ;;  %v782_v18 = vpack.c.bf16 %v746_v16, %v744_v59  ;;  %v575_v38 = vmul.f32 %v2014_v3, %v1809_v14  ;;  %v651_v7 = vadd.f32 %v1936_v62, %v611_v44  ;;  %v653_v23 = vadd.f32 %v1936_v62, %v613_v1 }
 0x188   :  { %v745_v5 = vmax.f32 %v717_v37, 0.0  ;;  %v747_v25 = vmax.f32 %v719_v45, 0.0  ;;  %960 = vmatprep.mubr.bf16.mxu1 %v781_v27  ;;  %v2371_v39 = vunpack.c.l.bf16 %v1955_v32  ;;  %v2372_v52 = vunpack.c.l.bf16 %v1960_v34 }
 0x189   :  { %v577_v46 = vmul.f32 %v2014_v3, %v1835_v57  ;;  %v615_v56 = vmul.f32 %v1932_v36, %v575_v38  ;;  %v574_v14 = vmul.f32 %v1984_v29, %v1805_v12  ;;  %v2373_v49 = vunpack.c.h.bf16 %v1955_v32  ;;  %v2097_v12 = vld [vmem:[%s2323_s1 + $0x50] sm:$0xff] }
 0x18a   :  { %v720_v17 = vadd.f32 %v2371_v39, %v650_v2  ;;  %v722_v40 = vadd.f32 %v2372_v52, %v652_v53  ;;  %v783_v0 = vpack.c.bf16 %v747_v25, %v745_v5  ;;  %v2374_v4 = vunpack.c.h.bf16 %v1960_v34  ;;  %v678_v53 = vld [vmem:[%s2323_s1 + $0x60] sm:$0xff]  ;;  %v679_v52 = vld [vmem:[%s2323_s1 + $0x68] sm:$0xff] }
 0x18b   :  { %v721_v41 = vadd.f32 %v2373_v49, %v651_v7  ;;  %v617_v30 = vmul.f32 %v1932_v36, %v577_v46  ;;  %v655_v48 = vadd.f32 %v1936_v62, %v615_v56  ;;  %v576_v57 = vmul.f32 %v1984_v29, %v1831_v54 }
 0x18c   :  { %v723_v35 = vadd.f32 %v2374_v4, %v653_v23  ;;  %v748_v11 = vmax.f32 %v720_v17, 0.0  ;;  %v750_v13 = vmax.f32 %v722_v40, 0.0  ;;  %v614_v61 = vmul.f32 %v1920_v50, %v574_v14 }
 0x18d   :  { %v749_v32 = vmax.f32 %v721_v41, 0.0  ;;  %v579_v15 = vmul.f32 %v2014_v3, %v1843_v60  ;;  %v657_v19 = vadd.f32 %v1936_v62, %v617_v30  ;;  %v2375_v47 = vunpack.c.h.bf16 %v1969_v31 }
 0x18e   :  { %v751_v55 = vmax.f32 %v723_v35, 0.0  ;;  %v784_v34 = vpack.c.bf16 %v750_v13, %v748_v11  ;;  %v616_v54 = vmul.f32 %v1920_v50, %v576_v57  ;;  %v654_v28 = vadd.f32 %v1934_v6, %v614_v61 }
 0x18f   :  { %v725_v27 = vadd.f32 %v2375_v47, %v655_v48  ;;  %v581_v37 = vmul.f32 %v2014_v3, %v1853_v26  ;;  %v619_v8 = vmul.f32 %v1932_v36, %v579_v15  ;;  %v701_v60 = vunpack.c.h.bf16 %v2097_v12  ;;  %961 = vmatmul.mubr.bf16.gmra.mrb[4].mxu1 %v2036_v42 }
 0x190   :  { %v785_v33 = vpack.c.bf16 %v751_v55, %v749_v32  ;;  %v2376_v45 = vunpack.c.h.bf16 %v1974_v20  ;;  %v656_v44 = vadd.f32 %v1934_v6, %v616_v54  ;;  %v2377_v1 = vunpack.c.l.bf16 %v1969_v31  ;;  %968 = vmatprep.mubr.bf16.mxu1 %v783_v0 }
 0x191   :  { %v753_v16 = vmax.f32 %v725_v27, 0.0  ;;  %v621_v26 = vmul.f32 %v1932_v36, %v581_v37  ;;  %v659_v5 = vadd.f32 %v1936_v62, %v619_v8  ;;  %v703_v25 = vunpack.c.h.bf16 %v677_v21 }
 0x192   :  { %v727_v59 = vadd.f32 %v2376_v45, %v657_v19  ;;  %v724_v2 = vadd.f32 %v2377_v1, %v654_v28  ;;  %v2378_v38 = vunpack.c.l.bf16 %v1974_v20  ;;  %v583_v39 = vmul.f32 %v2014_v3, %v1880_v9 }
 0x193   :  { %v661_v31 = vadd.f32 %v1936_v62, %v621_v26  ;;  %v729_v17 = vadd.f32 %v701_v60, %v659_v5  ;;  %v705_v40 = vunpack.c.h.bf16 %v678_v53  ;;  %v585_v56 = vmul.f32 %v2014_v3, %v1716_v43 }
 0x194   :  { %v755_v42 = vmax.f32 %v727_v59, 0.0  ;;  %v726_v7 = vadd.f32 %v2378_v38, %v656_v44  ;;  %v752_v23 = vmax.f32 %v724_v2, 0.0  ;;  %v623_v20 = vmul.f32 %v1932_v36, %v583_v39 }
 0x195   :  { %v731_v14 = vadd.f32 %v703_v25, %v661_v31  ;;  %v757_v49 = vmax.f32 %v729_v17, 0.0  ;;  %v625_v9 = vmul.f32 %v1932_v36, %v585_v56  ;;  %v707_v35 = vunpack.c.h.bf16 %v679_v52  ;;  %v2379_v31 = vld [vmem:[#allocation3_spill] sm:$0xff] }
 0x196   :  { %v787_v0 = vpack.c.bf16 %v755_v42, %v753_v16  ;;  %v754_v46 = vmax.f32 %v726_v7, 0.0  ;;  %v663_v4 = vadd.f32 %v1936_v62, %v623_v20  ;;  %v578_v43 = vmul.f32 %v1984_v29, %v1839_v58 }
 0x197   :  { %v759_v11 = vmax.f32 %v731_v14, 0.0  ;;  %969 = vmatmul.mubr.bf16.gmra.mrb[8].mxu1 %v782_v18  ;;  %v665_v13 = vadd.f32 %v1936_v62, %v625_v9  ;;  %v580_v3 = vmul.f32 %v1984_v29, %v1849_v24  ;;  %v700_v62 = vunpack.c.l.bf16 %v2097_v12 }
 0x198   :  { %v786_v41 = vpack.c.bf16 %v754_v46, %v752_v23  ;;  %v733_v30 = vadd.f32 %v705_v40, %v663_v4  ;;  %976 = vmatprep.mubr.bf16.mxu1 %v785_v33  ;;  %v618_v36 = vmul.f32 %v1920_v50, %v578_v43  ;;  %v702_v18 = vunpack.c.l.bf16 %v677_v21  ;;  %v2381_v4 = vld [vmem:[#allocation5_spill] sm:$0xff] }
 0x199   :  { %v789_v48 = vpack.c.bf16 %v759_v11, %v757_v49  ;;  %v735_v57 = vadd.f32 %v707_v35, %v665_v13  ;;  %v620_v55 = vmul.f32 %v1920_v50, %v580_v3  ;;  %v582_v24 = vmul.f32 %v1984_v29, %v1873_v22 }
 0x19a   :  { %v761_v61 = vmax.f32 %v733_v30, 0.0  ;;  %v658_v19 = vadd.f32 %v1934_v6, %v618_v36  ;;  %v584_v47 = vmul.f32 %v1984_v29, %v1691_v10  ;;  %v704_v12 = vunpack.c.l.bf16 %v678_v53  ;;  %v2382_v30 = vld [vmem:[#allocation6_spill] sm:$0xff] }
 0x19b   :  { %v763_v32 = vmax.f32 %v735_v57, 0.0  ;;  %v660_v58 = vadd.f32 %v1934_v6, %v620_v55  ;;  %v622_v28 = vmul.f32 %v1920_v50, %v582_v24  ;;  %v706_v21 = vunpack.c.l.bf16 %v679_v52  ;;  %v2383_v55 = vld [vmem:[#allocation7_spill] sm:$0xff] }
 0x19c   :  { %v728_v27 = vadd.f32 %v700_v62, %v658_v19  ;;  %v2384_v19 = vld [vmem:[#allocation8_spill] sm:$0xff] }
 0x19d   :  { %v791_v15 = vpack.c.bf16 %v763_v32, %v761_v61  ;;  %v730_v54 = vadd.f32 %v702_v18, %v660_v58  ;;  %v662_v8 = vadd.f32 %v1934_v6, %v622_v28 }
 0x19e   :  { %v756_v33 = vmax.f32 %v728_v27, 0.0 }
 0x19f   :  { %977 = vmatmul.mubr.bf16.gmra.mrb[12].mxu1 %v784_v34  ;;  %v624_v34 = vmul.f32 %v1920_v50, %v584_v47  ;;  %v758_v37 = vmax.f32 %v730_v54, 0.0  ;;  %v732_v45 = vadd.f32 %v704_v12, %v662_v8  ;;  %v2385_v12 = vld [vmem:[#allocation9_spill] sm:$0xff]  ;;  %v2386_v8 = vld [vmem:[#allocation10_spill] sm:$0xff] }
 0x1a0   :  { %984 = vmatprep.mubr.bf16.mxu1 %v787_v0  ;;  %v2380_v0 = vld [vmem:[#allocation4_spill] sm:$0xff] }
 0x1a1   :  { %v664_v60 = vadd.f32 %v1934_v6, %v624_v34  ;;  %v788_v22 = vpack.c.bf16 %v758_v37, %v756_v33  ;;  %v760_v10 = vmax.f32 %v732_v45, 0.0 }
 0x1a3   :  { %v734_v59 = vadd.f32 %v706_v21, %v664_v60 }
 0x1a5   :  { %v762_v29 = vmax.f32 %v734_v59, 0.0 }
 0x1a7   :  { %985 = vmatmul.mubr.bf16.gmra.mrb[16].mxu1 %v786_v41  ;;  %v790_v16 = vpack.c.bf16 %v762_v29, %v760_v10 }
 0x1a8   :  { %992 = vmatprep.mubr.bf16.mxu1 %v789_v48 }
 0x1af   :  { %993 = vmatmul.mubr.bf16.gmra.mrb[20].mxu1 %v788_v22 }
 0x1b0   :  { %1000 = vmatprep.mubr.bf16.mxu1 %v791_v15 }
 0x1b7   :  { %1001 = vmatmul.mubr.bf16.gmra.mrb[24].mxu1 %v790_v16 }
 0x25a   :  { %v1283_v50 = vpop.f32.mrb[0].mxu1 }
 0x25b   :  { %v1284_v44 = vpop.f32.mrb[1].mxu1 }
 0x25c   :  { %v2155_v1 = vadd.f32 %v1284_v44, %v1283_v50  ;;  %v1286_v2 = vpop.f32.mrb[2].mxu1  ;;  %v2387_v50 = vld [vmem:[#allocation11_spill] sm:$0xff] }
 0x25d   :  { %v1287_v53 = vpop.f32.mrb[3].mxu1 }
 0x25e   :  { %v2157_v26 = vadd.f32 %v1287_v53, %v1286_v2  ;;  %v1054_v6 = vmul.f32 %v2155_v1, %v1678_v51 }
 0x260   :  { %v1055_v5 = vmul.f32 %v2157_v26, %v1682_v63 }
 0x262   :  { %v1068_v25 = vadd.f32 %v1055_v5, %v1054_v6  ;;  %v1289_v42 = vpop.f32.mrb[4].mxu1  ;;  %v2388_v6 = vld [vmem:[#allocation12_spill] sm:$0xff] }
 0x263   :  { %v1290_v38 = vpop.f32.mrb[5].mxu1 }
 0x264   :  { %v2163_v7 = vadd.f32 %v1290_v38, %v1289_v42  ;;  %v1292_v23 = vpop.f32.mrb[6].mxu1 }
 0x265   :  { %v1293_v39 = vpop.f32.mrb[7].mxu1 }
 0x266   :  { %v1056_v17 = vmul.f32 %v2163_v7, %v2379_v31  ;;  %v2167_v52 = vadd.f32 %v1293_v39, %v1292_v23 }
 0x268   :  { %v1069_v40 = vadd.f32 %v1068_v25, %v1056_v17  ;;  %v1057_v46 = vmul.f32 %v2167_v52, %v2380_v0 }
 0x26a   :  { %v1070_v56 = vadd.f32 %v1069_v40, %v1057_v46  ;;  %v1295_v20 = vpop.f32.mrb[8].mxu1  ;;  %v2389_v40 = vld [vmem:[#allocation13_spill] sm:$0xff] }
 0x26b   :  { %v1296_v14 = vpop.f32.mrb[9].mxu1 }
 0x26c   :  { %v1297_v49 = vadd.f32 %v1296_v14, %v1295_v20  ;;  %v1298_v41 = vpop.f32.mrb[10].mxu1  ;;  %v2390_v14 = vld [vmem:[#allocation14_spill] sm:$0xff] }
 0x26d   :  { %v1299_v9 = vpop.f32.mrb[11].mxu1 }
 0x26e   :  { %v1058_v35 = vmul.f32 %v1297_v49, %v2381_v4  ;;  %v1300_v11 = vadd.f32 %v1299_v9, %v1298_v41 }
 0x270   :  { %v1071_v13 = vadd.f32 %v1070_v56, %v1058_v35  ;;  %v1059_v48 = vmul.f32 %v1300_v11, %v2382_v30 }
 0x272   :  { %v1072_v43 = vadd.f32 %v1071_v13, %v1059_v48  ;;  %v1301_v3 = vpop.f32.mrb[12].mxu1 }
 0x273   :  { %v1302_v57 = vpop.f32.mrb[13].mxu1 }
 0x274   :  { %v1303_v61 = vadd.f32 %v1302_v57, %v1301_v3  ;;  %v1304_v32 = vpop.f32.mrb[14].mxu1 }
 0x275   :  { %v1305_v36 = vpop.f32.mrb[15].mxu1 }
 0x276   :  { %v1060_v15 = vmul.f32 %v1303_v61, %v2383_v55  ;;  %v1306_v62 = vadd.f32 %v1305_v36, %v1304_v32 }
 0x278   :  { %v1073_v18 = vadd.f32 %v1072_v43, %v1060_v15  ;;  %v1061_v58 = vmul.f32 %v1306_v62, %v2384_v19 }
 0x27a   :  { %v1074_v24 = vadd.f32 %v1073_v18, %v1061_v58  ;;  %v1307_v47 = vpop.f32.mrb[16].mxu1 }
 0x27b   :  { %v1308_v27 = vpop.f32.mrb[17].mxu1 }
 0x27c   :  { %v1309_v54 = vadd.f32 %v1308_v27, %v1307_v47  ;;  %v1310_v28 = vpop.f32.mrb[18].mxu1 }
 0x27d   :  { %v1311_v34 = vpop.f32.mrb[19].mxu1 }
 0x27e   :  { %v1062_v21 = vmul.f32 %v1309_v54, %v2385_v12  ;;  %v1312_v33 = vadd.f32 %v1311_v34, %v1310_v28 }
 0x280   :  { %v1075_v37 = vadd.f32 %v1074_v24, %v1062_v21  ;;  %v1063_v60 = vmul.f32 %v1312_v33, %v2386_v8 }
 0x282   :  { %v1076_v22 = vadd.f32 %v1075_v37, %v1063_v60  ;;  %v1313_v45 = vpop.f32.mrb[20].mxu1 }
 0x283   :  { %v1314_v59 = vpop.f32.mrb[21].mxu1 }
 0x284   :  { %v1315_v10 = vadd.f32 %v1314_v59, %v1313_v45  ;;  %v1316_v29 = vpop.f32.mrb[22].mxu1 }
 0x285   :  { %v1317_v16 = vpop.f32.mrb[23].mxu1 }
 0x286   :  { %v1064_v44 = vmul.f32 %v1315_v10, %v2387_v50  ;;  %v1318_v2 = vadd.f32 %v1317_v16, %v1316_v29 }
 0x288   :  { %v1077_v53 = vadd.f32 %v1076_v22, %v1064_v44  ;;  %v1065_v5 = vmul.f32 %v1318_v2, %v2388_v6 }
 0x28a   :  { %v1078_v25 = vadd.f32 %v1077_v53, %v1065_v5  ;;  %v1319_v42 = vpop.f32.mrb[24].mxu1 }
 0x28b   :  { %v1320_v38 = vpop.f32.mrb[25].mxu1 }
 0x28c   :  { %v1321_v23 = vadd.f32 %v1320_v38, %v1319_v42  ;;  %v1322_v39 = vpop.f32.mrb[26].mxu1 }
 0x28d   :  { %v1323_v17 = vpop.f32.mrb[27].mxu1 }
 0x28e   :  { %v1066_v46 = vmul.f32 %v1321_v23, %v2389_v40  ;;  %v1324_v56 = vadd.f32 %v1323_v17, %v1322_v39 }
 0x290   :  { %v1079_v20 = vadd.f32 %v1078_v25, %v1066_v46  ;;  %v1067_v41 = vmul.f32 %v1324_v56, %v2390_v14 }
 0x292   :  { %v1080_v9 = vadd.f32 %v1079_v20, %v1067_v41 }
 0x294   :  { %v1081_v35 = vrot.slane %v1080_v9, 4 }
 0x296   :  { %v1082_v13 = vadd.f32 %v1081_v35, %v1080_v9 }
 0x298   :  { %v1083_v48 = vrot.slane %v1082_v13, 2 }
 0x29a   :  { %v1084_v43 = vadd.f32 %v1083_v48, %v1082_v13 }
 0x29c   :  { %v1085_v3 = vrot.slane %v1084_v43, 1 }
 0x29e   :  { %v1086_v57 = vadd.f32 %v1085_v3, %v1084_v43 }
 0x2a0   :  { %v1087_v32 = vmul.f32 0.010204081, %v1086_v57 }
 0x2a2   :  { %v2182_v36 = vsub.f32 %v2155_v1, %v1087_v32  ;;  %v2185_v15 = vsub.f32 %v2157_v26, %v1087_v32  ;;  %v2188_v18 = vsub.f32 %v2163_v7, %v1087_v32  ;;  %v2191_v58 = vsub.f32 %v2167_v52, %v1087_v32 }
 0x2a3   :  { %v2193_v24 = vsub.f32 %v1297_v49, %v1087_v32  ;;  %v2195_v47 = vsub.f32 %v1300_v11, %v1087_v32  ;;  %v2197_v27 = vsub.f32 %v1303_v61, %v1087_v32  ;;  %v2199_v28 = vsub.f32 %v1306_v62, %v1087_v32 }
 0x2a4   :  { %v2201_v34 = vsub.f32 %v1309_v54, %v1087_v32  ;;  %v2203_v1 = vsub.f32 %v1312_v33, %v1087_v32  ;;  %v2205_v26 = vsub.f32 %v1315_v10, %v1087_v32  ;;  %v2207_v21 = vsub.f32 %v1318_v2, %v1087_v32 }
 0x2a5   :  { %v2209_v7 = vsub.f32 %v1321_v23, %v1087_v32  ;;  %v2211_v52 = vsub.f32 %v1324_v56, %v1087_v32  ;;  %v1102_v49 = vmul.f32 %v2182_v36, %v2182_v36  ;;  %v1103_v11 = vmul.f32 %v2185_v15, %v2185_v15 }
 0x2a6   :  { %v1104_v61 = vmul.f32 %v2188_v18, %v2188_v18  ;;  %v1105_v33 = vmul.f32 %v2191_v58, %v2191_v58  ;;  %v1106_v37 = vmul.f32 %v2193_v24, %v2193_v24  ;;  %v1107_v45 = vmul.f32 %v2195_v47, %v2195_v47 }
 0x2a7   :  { %v1116_v62 = vmul.f32 %v1102_v49, %v1678_v51  ;;  %v1117_v54 = vmul.f32 %v1103_v11, %v1682_v63  ;;  %v1108_v51 = vmul.f32 %v2197_v27, %v2197_v27  ;;  %v1109_v16 = vmul.f32 %v2199_v28, %v2199_v28 }
 0x2a8   :  { %v1118_v60 = vmul.f32 %v1104_v61, %v2379_v31  ;;  %v1119_v59 = vmul.f32 %v1105_v33, %v2380_v0  ;;  %v1120_v63 = vmul.f32 %v1106_v37, %v2381_v4  ;;  %v1121_v44 = vmul.f32 %v1107_v45, %v2382_v30 }
 0x2a9   :  { %v1130_v22 = vadd.f32 %v1117_v54, %v1116_v62  ;;  %v1110_v31 = vmul.f32 %v2201_v34, %v2201_v34  ;;  %v1122_v53 = vmul.f32 %v1108_v51, %v2383_v55  ;;  %v1111_v0 = vmul.f32 %v2203_v1, %v2203_v1  ;;  %v1265_v54 = vld [vmem:[%s2324_s7] ss:$0 sm:$0xff] }
 0x2aa   :  { %v1123_v25 = vmul.f32 %v1109_v16, %v2384_v19  ;;  %v1112_v4 = vmul.f32 %v2205_v26, %v2205_v26  ;;  %v1113_v30 = vmul.f32 %v2207_v21, %v2207_v21  ;;  %v1114_v55 = vmul.f32 %v2209_v7, %v2209_v7 }
 0x2ab   :  { %v1131_v10 = vadd.f32 %v1130_v22, %v1118_v60  ;;  %v1124_v38 = vmul.f32 %v1110_v31, %v2385_v12  ;;  %v1125_v39 = vmul.f32 %v1111_v0, %v2386_v8  ;;  %v1115_v19 = vmul.f32 %v2211_v52, %v2211_v52 }
 0x2ac   :  { %v1126_v46 = vmul.f32 %v1112_v4, %v2387_v50  ;;  %v1127_v20 = vmul.f32 %v1113_v30, %v2388_v6  ;;  %v1128_v12 = vmul.f32 %v1114_v55, %v2389_v40 }
 0x2ad   :  { %v1132_v29 = vadd.f32 %v1131_v10, %v1119_v59  ;;  %v1129_v35 = vmul.f32 %v1115_v19, %v2390_v14 }
 0x2af   :  { %v1133_v2 = vadd.f32 %v1132_v29, %v1120_v63 }
 0x2b1   :  { %v1134_v5 = vadd.f32 %v1133_v2, %v1121_v44 }
 0x2b3   :  { %v1135_v42 = vadd.f32 %v1134_v5, %v1122_v53 }
 0x2b5   :  { %v1136_v23 = vadd.f32 %v1135_v42, %v1123_v25 }
 0x2b7   :  { %v1137_v17 = vadd.f32 %v1136_v23, %v1124_v38 }
 0x2b9   :  { %v1138_v56 = vadd.f32 %v1137_v17, %v1125_v39 }
 0x2bb   :  { %v1139_v41 = vadd.f32 %v1138_v56, %v1126_v46 }
 0x2bd   :  { %v1140_v9 = vadd.f32 %v1139_v41, %v1127_v20 }
 0x2bf   :  { %v1141_v13 = vadd.f32 %v1140_v9, %v1128_v12 }
 0x2c1   :  { %v1142_v8 = vadd.f32 %v1141_v13, %v1129_v35 }
 0x2c3   :  { %v1143_v48 = vrot.slane %v1142_v8, 4 }
 0x2c5   :  { %v1144_v43 = vadd.f32 %v1143_v48, %v1142_v8 }
 0x2c7   :  { %v1145_v3 = vrot.slane %v1144_v43, 2 }
 0x2c9   :  { %v1146_v57 = vadd.f32 %v1145_v3, %v1144_v43 }
 0x2cb   :  { %v1147_v32 = vrot.slane %v1146_v57, 1 }
 0x2cd   :  { %v1148_v50 = vadd.f32 %v1147_v32, %v1146_v57 }
 0x2cf   :  { %v1149_v49 = vmul.f32 0.010204081, %v1148_v50 }
 0x2d1   :  { %v1150_v11 = vadd.f32 1e-05, %v1149_v49 }
 0x2d3   :  { %1379 = vrsqrt.f32 %v1150_v11 }
 0x2dd   :  { %v1380_v61 = vpop.eup %1379 }
 0x2de   :  { %v1152_v6 = vmul.f32 %v1380_v61, %v2182_v36  ;;  %v1153_v62 = vmul.f32 %v1380_v61, %v2185_v15  ;;  %v1154_v40 = vmul.f32 %v1380_v61, %v2188_v18  ;;  %v1155_v14 = vmul.f32 %v1380_v61, %v2191_v58 }
 0x2df   :  { %v1156_v33 = vmul.f32 %v1380_v61, %v2193_v24  ;;  %v1157_v37 = vmul.f32 %v1380_v61, %v2195_v47  ;;  %v1158_v60 = vmul.f32 %v1380_v61, %v2197_v27  ;;  %v1159_v22 = vmul.f32 %v1380_v61, %v2199_v28  ;;  %v1266_v28 = vld [vmem:[%s2325_s8] ss:$0 sm:$0xff] }
 0x2e0   :  { %v1160_v36 = vmul.f32 %v1380_v61, %v2201_v34  ;;  %v1161_v15 = vmul.f32 %v1380_v61, %v2203_v1  ;;  %v1162_v18 = vmul.f32 %v1380_v61, %v2205_v26  ;;  %v1163_v58 = vmul.f32 %v1380_v61, %v2207_v21 }
 0x2e1   :  { %v1164_v45 = vmul.f32 %v1380_v61, %v2209_v7  ;;  %v1165_v59 = vmul.f32 %v1380_v61, %v2211_v52  ;;  %v1173_v10 = vmul.f32 %v1265_v54, %v1152_v6  ;;  %v1174_v24 = vmul.f32 %v1265_v54, %v1153_v62 }
 0x2e2   :  { %v1175_v51 = vmul.f32 %v1265_v54, %v1154_v40  ;;  %v1176_v47 = vmul.f32 %v1265_v54, %v1155_v14  ;;  %v1177_v63 = vmul.f32 %v1265_v54, %v1156_v33  ;;  %v1178_v27 = vmul.f32 %v1265_v54, %v1157_v37 }
 0x2e3   :  { %v1179_v34 = vmul.f32 %v1265_v54, %v1158_v60  ;;  %v1180_v1 = vmul.f32 %v1265_v54, %v1159_v22  ;;  %v1181_v29 = vmul.f32 %v1265_v54, %v1160_v36  ;;  %v1182_v26 = vmul.f32 %v1265_v54, %v1161_v15 }
 0x2e4   :  { %v1183_v16 = vmul.f32 %v1265_v54, %v1162_v18  ;;  %v1184_v21 = vmul.f32 %v1265_v54, %v1163_v58  ;;  %v1185_v44 = vmul.f32 %v1265_v54, %v1164_v45  ;;  %v1186_v7 = vmul.f32 %v1265_v54, %v1165_v59 }
 0x2e5   :  { %v1194_v2 = vadd.f32 %v1266_v28, %v1173_v10  ;;  %v1195_v52 = vadd.f32 %v1266_v28, %v1174_v24  ;;  %v1196_v31 = vadd.f32 %v1266_v28, %v1175_v51  ;;  %v1197_v53 = vadd.f32 %v1266_v28, %v1176_v47 }
 0x2e6   :  { %v1198_v5 = vadd.f32 %v1266_v28, %v1177_v63  ;;  %v1199_v0 = vadd.f32 %v1266_v28, %v1178_v27  ;;  %v1200_v25 = vadd.f32 %v1266_v28, %v1179_v34  ;;  %v1201_v42 = vadd.f32 %v1266_v28, %v1180_v1 }
 0x2e7   :  { %v1202_v4 = vadd.f32 %v1266_v28, %v1181_v29  ;;  %v1203_v38 = vadd.f32 %v1266_v28, %v1182_v26  ;;  %v1204_v23 = vadd.f32 %v1266_v28, %v1183_v16  ;;  %v1205_v30 = vadd.f32 %v1266_v28, %v1184_v21  ;;  %1208 = vst [vmem:[%s2326_s9] sm:$0xff] %v1194_v2 }
 0x2e8   :  { %1209 = vst [vmem:[%s2326_s9 + $0x8] sm:$0xff] %v1195_v52  ;;  %1210 = vst [vmem:[%s2326_s9 + $0x10] sm:$0xff] %v1196_v31  ;;  %v1206_v39 = vadd.f32 %v1266_v28, %v1185_v44  ;;  %v1207_v17 = vadd.f32 %v1266_v28, %v1186_v7 }
 0x2e9   :  { %1211 = vst [vmem:[%s2326_s9 + $0x18] sm:$0xff] %v1197_v53  ;;  %1212 = vst [vmem:[%s2326_s9 + $0x20] sm:$0xff] %v1198_v5 }
 0x2ea   :  { %1213 = vst [vmem:[%s2326_s9 + $0x28] sm:$0xff] %v1199_v0  ;;  %1214 = vst [vmem:[%s2326_s9 + $0x30] sm:$0xff] %v1200_v25 }
 0x2eb   :  { %1215 = vst [vmem:[%s2326_s9 + $0x38] sm:$0xff] %v1201_v42  ;;  %1216 = vst [vmem:[%s2326_s9 + $0x40] sm:$0xff] %v1202_v4 }
 0x2ec   :  { %1217 = vst [vmem:[%s2326_s9 + $0x48] sm:$0xff] %v1203_v38  ;;  %1218 = vst [vmem:[%s2326_s9 + $0x50] sm:$0xff] %v1204_v23 }
 0x2ed   :  { %1219 = vst [vmem:[%s2326_s9 + $0x58] sm:$0xff] %v1205_v30  ;;  %1220 = vst [vmem:[%s2326_s9 + $0x60] sm:$0xff] %v1206_v39 }
 0x2ee   :  { %1221 = vst [vmem:[%s2326_s9 + $0x68] sm:$0xff] %v1207_v17 }

</bundles_post_ra>
